<compile_context>
chip_gen: v7x
topology: tpu7x:2x2x1
jax: 0.10.0
libtpu: 0.0.40
codegen_flags: <defaults>
</compile_context>

<pallas_src>
import jax
import jax.numpy as jnp
from jax.experimental import pallas as pl
from jax.experimental.pallas import tpu as pltpu

# ----- small, module-consistent hyperparameters -----
B = 2            # batch
C = 32           # channels
T = 16           # sequence length
KS = 3           # kernel_size
SCALE = 4        # FFN hidden scale
CS = C * SCALE   # hidden channels (128)
PAD = KS // 2
BT = B * T       # batch folded into the sublane axis


# ----------------------------------------------------------------------------
# Kernel helpers
# ----------------------------------------------------------------------------
def _masked_conv_taps(z, w_ref, b_row):
    """'Same'-padded conv1d over the time-major slab z (B*T, Cin), expressed as KS
    accumulated matmuls of time-shifted taps against w_ref (KS, Cin, Cout).
    Rows whose shift crosses a batch boundary (or falls outside [0, T)) are zeroed."""
    t_in_batch = jax.lax.broadcasted_iota(jnp.int32, z.shape, 0) % T
    acc = None
    for j in range(KS):
        d = j - PAD                                         # time offset of this tap
        if d == 0:
            s = z
        else:
            s = pltpu.roll(z, shift=(-d) % BT, axis=0)      # s[r] = z[r + d] (wrapped)
            if d < 0:
                s = jnp.where(t_in_batch < -d, 0.0, s)      # t + d < 0  -> zero pad
            else:
                s = jnp.where(t_in_batch >= T - d, 0.0, s)  # t + d >= T -> zero pad
        part = jnp.dot(s.astype(jnp.bfloat16), w_ref[j],
                       preferred_element_type=jnp.float32)
        acc = part if acc is None else acc + part
    return acc + b_row


def _ffn_kernel(x_ref, m_ref, w1_ref, b1_ref, w2_ref, b2_ref, out_ref):
    # ---- native (C, T) -> time-major (B*T, C); conv_1 input mask applied pre-transpose
    xm_parts, mcol_parts = [], []
    for b in range(B):
        xm_b = x_ref[b] * m_ref[b]                      # (C, T) * (1, T) -> (C, T)
        xm_parts.append(jnp.transpose(xm_b))            # (T, C)
        m8 = jnp.broadcast_to(m_ref[b], (8, T))         # sublane broadcast (8, T)
        mcol_parts.append(jnp.transpose(m8)[:, :1])     # (T, 1) time-major mask column
    x_tm = jnp.concatenate(xm_parts, axis=0)            # (B*T, C)
    m_col = jnp.concatenate(mcol_parts, axis=0)         # (B*T, 1)

    # ---- conv_1 -> ReLU (dropout = identity in eval mode) ----
    h = _masked_conv_taps(x_tm, w1_ref, b1_ref[...])    # (B*T, CS) f32
    h = jnp.maximum(h, 0.0)

    # ---- conv_2 on the mask-gated hidden ----
    y = _masked_conv_taps(h * m_col, w2_ref, b2_ref[...])   # (B*T, C) f32

    # ---- back to native (B, C, T) with the final mask ----
    for b in range(B):
        yb = jnp.transpose(y[b * T:(b + 1) * T, :])     # (C, T)
        out_ref[b] = (yb * m_ref[b]).astype(out_ref.dtype)


# ----------------------------------------------------------------------------
# One-shot parameter prep (hoisted out of the per-call path)
# ----------------------------------------------------------------------------
def prep_params(p):
    return {
        # stack conv taps as (KS, Cin, Cout); bf16 for the MXU
        'w1': jnp.transpose(p['W1'], (2, 1, 0)).astype(jnp.bfloat16),  # (KS, C, CS)
        'w2': jnp.transpose(p['W2'], (2, 1, 0)).astype(jnp.bfloat16),  # (KS, CS, C)
        'b1': p['b1'].reshape(1, CS).astype(jnp.float32),
        'b2': p['b2'].reshape(1, C).astype(jnp.float32),
    }


# ----------------------------------------------------------------------------
# Forward wrapper: a single pallas_call, no surrounding XLA ops
# ----------------------------------------------------------------------------
def ffn_pallas(x_bct, mask_b1t, pp):
    return pl.pallas_call(
        _ffn_kernel,
        out_shape=jax.ShapeDtypeStruct((B, C, T), jnp.float32),
        grid=(1,),
        in_specs=[
            pl.BlockSpec((B, C, T), lambda i: (0, 0, 0)),      # x   (native layout)
            pl.BlockSpec((B, 1, T), lambda i: (0, 0, 0)),      # mask (native layout)
            pl.BlockSpec((KS, C, CS), lambda i: (0, 0, 0)),    # W1 taps (bf16)
            pl.BlockSpec((1, CS), lambda i: (0, 0)),           # b1
            pl.BlockSpec((KS, CS, C), lambda i: (0, 0, 0)),    # W2 taps (bf16)
            pl.BlockSpec((1, C), lambda i: (0, 0)),            # b2
        ],
        out_specs=pl.BlockSpec((B, C, T), lambda i: (0, 0, 0)),
        compiler_params=pltpu.CompilerParams(dimension_semantics=("arbitrary",)),
    )(x_bct, mask_b1t, pp['w1'], pp['b1'], pp['w2'], pp['b2'])


# ----------------------------------------------------------------------------
# Deterministic parameter init (shapes from the module __init__)
# ----------------------------------------------------------------------------
def init_params(key):
    k1, k2, k3, k4 = jax.random.split(key, 4)
    p = {}
    p['W1'] = jax.random.normal(k1, (CS, C, KS), jnp.float32) * (1.0 / (C * KS)) ** 0.5
    p['b1'] = jax.random.uniform(k2, (CS,), jnp.float32, -0.05, 0.05)
    p['W2'] = jax.random.normal(k3, (C, CS, KS), jnp.float32) * (1.0 / (CS * KS)) ** 0.5
    p['b2'] = jax.random.uniform(k4, (C,), jnp.float32, -0.05, 0.05)
    return p


# ----------------------------------------------------------------------------
# Pure-JAX reference mirroring the torch forward
# ----------------------------------------------------------------------------
def reference_forward(x, mask, p):
    def conv1d(z, W, b):
        out = jax.lax.conv_general_dilated(
            z, W, window_strides=(1,), padding=[(PAD, PAD)],
            dimension_numbers=('NCH', 'OIH', 'NCH'))
        return out + b[None, :, None]

    h = jnp.maximum(conv1d(x * mask, p['W1'], p['b1']), 0.0)   # conv_1 + relu (drop=id)
    y = conv1d(h * mask, p['W2'], p['b2'])                     # conv_2
    return y * mask


if __name__ == "__main__":
    key = jax.random.PRNGKey(0)
    kx, kp = jax.random.split(key)
    params = init_params(kp)
    prepped = prep_params(params)    # one-shot prep, outside the forward path

    x = jax.random.normal(kx, (B, C, T), jnp.float32)
    lengths = jnp.array([T, T - 5])
    mask = (jnp.arange(T)[None, :] < lengths[:, None]).astype(jnp.float32)[:, None, :]

    out = jax.block_until_ready(ffn_pallas(x, mask, prepped))

    with jax.default_matmul_precision('highest'):
        ref = reference_forward(x, mask, params)

    max_err = float(jnp.max(jnp.abs(out - ref)))
    # bf16 matmul operands with f32 accumulation -> relaxed tolerance
    if not jnp.allclose(out, ref, atol=3e-2, rtol=3e-2):
        raise AssertionError(f"Pallas output mismatch vs reference, max abs err = {max_err}")

    print("KERNEL_OK")
</pallas_src>

<mosaic_0001>
module attributes {stable_mosaic.version = 11 : i64} {
  func.func @_ffn_kernel(%arg0: i32, %arg1: memref<2x32x16xf32, #tpu.memory_space<vmem>>, %arg2: memref<2x1x16xf32, #tpu.memory_space<vmem>>, %arg3: memref<3x32x128xbf16, #tpu.memory_space<vmem>>, %arg4: memref<1x128xf32, #tpu.memory_space<vmem>>, %arg5: memref<3x128x32xbf16, #tpu.memory_space<vmem>>, %arg6: memref<1x32xf32, #tpu.memory_space<vmem>>, %arg7: memref<2x32x16xf32, #tpu.memory_space<vmem>>) attributes {dimension_semantics = [#tpu.dimension_semantics<arbitrary>], iteration_bounds = array<i64: 1>, scalar_prefetch = 0 : i64, scratch_operands = 0 : i64, tpu.core_type = #tpu.core_type<tc>, window_params = [{pipeline_mode = #tpu.pipeline_mode<synchronous>, transform_indices = @transform_0, window_bounds = array<i64: 2, 32, 16>}, {pipeline_mode = #tpu.pipeline_mode<synchronous>, transform_indices = @transform_1, window_bounds = array<i64: 2, 1, 16>}, {pipeline_mode = #tpu.pipeline_mode<synchronous>, transform_indices = @transform_2, window_bounds = array<i64: 3, 32, 128>}, {pipeline_mode = #tpu.pipeline_mode<synchronous>, transform_indices = @transform_3, window_bounds = array<i64: 1, 128>}, {pipeline_mode = #tpu.pipeline_mode<synchronous>, transform_indices = @transform_4, window_bounds = array<i64: 3, 128, 32>}, {pipeline_mode = #tpu.pipeline_mode<synchronous>, transform_indices = @transform_5, window_bounds = array<i64: 1, 32>}, {pipeline_mode = #tpu.pipeline_mode<synchronous>, transform_indices = @transform_6, window_bounds = array<i64: 2, 32, 16>}]} {
    %c0 = arith.constant 0 : index
    %c0_0 = arith.constant 0 : index
    %c0_1 = arith.constant 0 : index
    %0 = vector.load %arg1[%c0, %c0_0, %c0_1] : memref<2x32x16xf32, #tpu.memory_space<vmem>>, vector<1x32x16xf32>
    %1 = vector.shape_cast %0 : vector<1x32x16xf32> to vector<32x16xf32>
    %c0_2 = arith.constant 0 : index
    %c0_3 = arith.constant 0 : index
    %c0_4 = arith.constant 0 : index
    %2 = vector.load %arg2[%c0_2, %c0_3, %c0_4] : memref<2x1x16xf32, #tpu.memory_space<vmem>>, vector<1x1x16xf32>
    %3 = vector.shape_cast %2 : vector<1x1x16xf32> to vector<1x16xf32>
    %4 = vector.broadcast %3 : vector<1x16xf32> to vector<32x16xf32>
    %5 = arith.mulf %1, %4 : vector<32x16xf32>
    %6 = tpu.transpose %5, [1, 0] : vector<32x16xf32> -> vector<16x32xf32>
    %c0_5 = arith.constant 0 : index
    %c0_6 = arith.constant 0 : index
    %c0_7 = arith.constant 0 : index
    %7 = vector.load %arg2[%c0_5, %c0_6, %c0_7] : memref<2x1x16xf32, #tpu.memory_space<vmem>>, vector<1x1x16xf32>
    %8 = vector.shape_cast %7 : vector<1x1x16xf32> to vector<1x16xf32>
    %9 = vector.shape_cast %8 : vector<1x16xf32> to vector<1x16xf32>
    %10 = vector.broadcast %9 : vector<1x16xf32> to vector<8x16xf32>
    %11 = tpu.transpose %10, [1, 0] : vector<8x16xf32> -> vector<16x8xf32>
    %12 = vector.extract_strided_slice %11 {offsets = [0, 0], sizes = [16, 1], strides = [1, 1]} : vector<16x8xf32> to vector<16x1xf32>
    %c1 = arith.constant 1 : index
    %c0_8 = arith.constant 0 : index
    %c0_9 = arith.constant 0 : index
    %13 = vector.load %arg1[%c1, %c0_8, %c0_9] : memref<2x32x16xf32, #tpu.memory_space<vmem>>, vector<1x32x16xf32>
    %14 = vector.shape_cast %13 : vector<1x32x16xf32> to vector<32x16xf32>
    %c1_10 = arith.constant 1 : index
    %c0_11 = arith.constant 0 : index
    %c0_12 = arith.constant 0 : index
    %15 = vector.load %arg2[%c1_10, %c0_11, %c0_12] : memref<2x1x16xf32, #tpu.memory_space<vmem>>, vector<1x1x16xf32>
    %16 = vector.shape_cast %15 : vector<1x1x16xf32> to vector<1x16xf32>
    %17 = vector.broadcast %16 : vector<1x16xf32> to vector<32x16xf32>
    %18 = arith.mulf %14, %17 : vector<32x16xf32>
    %19 = tpu.transpose %18, [1, 0] : vector<32x16xf32> -> vector<16x32xf32>
    %c1_13 = arith.constant 1 : index
    %c0_14 = arith.constant 0 : index
    %c0_15 = arith.constant 0 : index
    %20 = vector.load %arg2[%c1_13, %c0_14, %c0_15] : memref<2x1x16xf32, #tpu.memory_space<vmem>>, vector<1x1x16xf32>
    %21 = vector.shape_cast %20 : vector<1x1x16xf32> to vector<1x16xf32>
    %22 = vector.shape_cast %21 : vector<1x16xf32> to vector<1x16xf32>
    %23 = vector.broadcast %22 : vector<1x16xf32> to vector<8x16xf32>
    %24 = tpu.transpose %23, [1, 0] : vector<8x16xf32> -> vector<16x8xf32>
    %25 = vector.extract_strided_slice %24 {offsets = [0, 0], sizes = [16, 1], strides = [1, 1]} : vector<16x8xf32> to vector<16x1xf32>
    %26 = tpu.concatenate %6, %19 in 0 : vector<16x32xf32>, vector<16x32xf32> -> vector<32x32xf32>
    %27 = tpu.concatenate %12, %25 in 0 : vector<16x1xf32>, vector<16x1xf32> -> vector<32x1xf32>
    %c0_16 = arith.constant 0 : index
    %c0_17 = arith.constant 0 : index
    %28 = vector.load %arg4[%c0_16, %c0_17] : memref<1x128xf32, #tpu.memory_space<vmem>>, vector<1x128xf32>
    %29 = tpu.iota {dimensions = array<i32: 0>} : vector<32x32xi32>
    %c16_i32 = arith.constant 16 : i32
    %c0_i32 = arith.constant 0 : i32
    %30 = arith.cmpi eq, %c16_i32, %c0_i32 : i32
    %c1_i32 = arith.constant 1 : i32
    %31 = arith.select %30, %c1_i32, %c16_i32 : i32
    %32 = vector.broadcast %31 : i32 to vector<32x32xi32>
    %33 = arith.remsi %29, %32 : vector<32x32xi32>
    %c0_i32_18 = arith.constant 0 : i32
    %34 = vector.broadcast %c0_i32_18 : i32 to vector<32x32xi32>
    %35 = arith.cmpi ne, %33, %34 : vector<32x32xi32>
    %c0_i32_19 = arith.constant 0 : i32
    %36 = vector.broadcast %c0_i32_19 : i32 to vector<32x32xi32>
    %37 = arith.cmpi slt, %33, %36 : vector<32x32xi32>
    %c0_i32_20 = arith.constant 0 : i32
    %38 = arith.cmpi slt, %31, %c0_i32_20 : i32
    %39 = vector.broadcast %38 : i1 to vector<32x32xi1>
    %40 = vector.broadcast %39 : vector<32x32xi1> to vector<32x32xi1>
    %41 = arith.xori %37, %40 : vector<32x32xi1>
    %42 = arith.andi %41, %35 : vector<32x32xi1>
    %43 = vector.broadcast %31 : i32 to vector<32x32xi32>
    %44 = arith.addi %33, %43 : vector<32x32xi32>
    %45 = arith.select %42, %44, %33 : vector<32x32xi1>, vector<32x32xi32>
    %c1_i32_21 = arith.constant 1 : i32
    %46 = tpu.dynamic_rotate %26 by %c1_i32_21 dim 0 : vector<32x32xf32>, i32 -> vector<32x32xf32>
    %c1_i32_22 = arith.constant 1 : i32
    %47 = vector.broadcast %c1_i32_22 : i32 to vector<32x32xi32>
    %48 = arith.cmpi slt, %45, %47 : vector<32x32xi32>
    %cst = arith.constant 0.000000e+00 : f32
    %49 = vector.broadcast %cst : f32 to vector<32x32xf32>
    %50 = arith.select %48, %49, %46 : vector<32x32xi1>, vector<32x32xf32>
    %51 = arith.truncf %50 : vector<32x32xf32> to vector<32x32xbf16>
    %c0_23 = arith.constant 0 : index
    %c0_24 = arith.constant 0 : index
    %c0_25 = arith.constant 0 : index
    %52 = vector.load %arg3[%c0_23, %c0_24, %c0_25] : memref<3x32x128xbf16, #tpu.memory_space<vmem>>, vector<1x32x128xbf16>
    %53 = vector.shape_cast %52 : vector<1x32x128xbf16> to vector<32x128xbf16>
    %cst_26 = arith.constant dense<0.000000e+00> : vector<32x128xf32>
    %54 = tpu.matmul %51, %53, %cst_26 {dimension_numbers = #tpu.dot_dimension_numbers<[1], [0], [0], [1], [0, 0, 1, 1], [], []>} : vector<32x32xbf16>, vector<32x128xbf16>, vector<32x128xf32> -> vector<32x128xf32>
    %55 = arith.truncf %26 : vector<32x32xf32> to vector<32x32xbf16>
    %c1_27 = arith.constant 1 : index
    %c0_28 = arith.constant 0 : index
    %c0_29 = arith.constant 0 : index
    %56 = vector.load %arg3[%c1_27, %c0_28, %c0_29] : memref<3x32x128xbf16, #tpu.memory_space<vmem>>, vector<1x32x128xbf16>
    %57 = vector.shape_cast %56 : vector<1x32x128xbf16> to vector<32x128xbf16>
    %cst_30 = arith.constant dense<0.000000e+00> : vector<32x128xf32>
    %58 = tpu.matmul %55, %57, %cst_30 {dimension_numbers = #tpu.dot_dimension_numbers<[1], [0], [0], [1], [0, 0, 1, 1], [], []>} : vector<32x32xbf16>, vector<32x128xbf16>, vector<32x128xf32> -> vector<32x128xf32>
    %59 = arith.addf %54, %58 : vector<32x128xf32>
    %c31_i32 = arith.constant 31 : i32
    %60 = tpu.dynamic_rotate %26 by %c31_i32 dim 0 : vector<32x32xf32>, i32 -> vector<32x32xf32>
    %c15_i32 = arith.constant 15 : i32
    %61 = vector.broadcast %c15_i32 : i32 to vector<32x32xi32>
    %62 = arith.cmpi sge, %45, %61 : vector<32x32xi32>
    %cst_31 = arith.constant 0.000000e+00 : f32
    %63 = vector.broadcast %cst_31 : f32 to vector<32x32xf32>
    %64 = arith.select %62, %63, %60 : vector<32x32xi1>, vector<32x32xf32>
    %65 = arith.truncf %64 : vector<32x32xf32> to vector<32x32xbf16>
    %c2 = arith.constant 2 : index
    %c0_32 = arith.constant 0 : index
    %c0_33 = arith.constant 0 : index
    %66 = vector.load %arg3[%c2, %c0_32, %c0_33] : memref<3x32x128xbf16, #tpu.memory_space<vmem>>, vector<1x32x128xbf16>
    %67 = vector.shape_cast %66 : vector<1x32x128xbf16> to vector<32x128xbf16>
    %cst_34 = arith.constant dense<0.000000e+00> : vector<32x128xf32>
    %68 = tpu.matmul %65, %67, %cst_34 {dimension_numbers = #tpu.dot_dimension_numbers<[1], [0], [0], [1], [0, 0, 1, 1], [], []>} : vector<32x32xbf16>, vector<32x128xbf16>, vector<32x128xf32> -> vector<32x128xf32>
    %69 = arith.addf %59, %68 : vector<32x128xf32>
    %70 = vector.broadcast %28 : vector<1x128xf32> to vector<32x128xf32>
    %71 = arith.addf %69, %70 : vector<32x128xf32>
    %cst_35 = arith.constant 0.000000e+00 : f32
    %72 = vector.broadcast %cst_35 : f32 to vector<32x128xf32>
    %73 = arith.maximumf %71, %72 : vector<32x128xf32>
    %74 = vector.broadcast %27 : vector<32x1xf32> to vector<32x128xf32>
    %75 = arith.mulf %73, %74 : vector<32x128xf32>
    %c0_36 = arith.constant 0 : index
    %c0_37 = arith.constant 0 : index
    %76 = vector.load %arg6[%c0_36, %c0_37] : memref<1x32xf32, #tpu.memory_space<vmem>>, vector<1x32xf32>
    %77 = tpu.iota {dimensions = array<i32: 0>} : vector<32x128xi32>
    %c16_i32_38 = arith.constant 16 : i32
    %c0_i32_39 = arith.constant 0 : i32
    %78 = arith.cmpi eq, %c16_i32_38, %c0_i32_39 : i32
    %c1_i32_40 = arith.constant 1 : i32
    %79 = arith.select %78, %c1_i32_40, %c16_i32_38 : i32
    %80 = vector.broadcast %79 : i32 to vector<32x128xi32>
    %81 = arith.remsi %77, %80 : vector<32x128xi32>
    %c0_i32_41 = arith.constant 0 : i32
    %82 = vector.broadcast %c0_i32_41 : i32 to vector<32x128xi32>
    %83 = arith.cmpi ne, %81, %82 : vector<32x128xi32>
    %c0_i32_42 = arith.constant 0 : i32
    %84 = vector.broadcast %c0_i32_42 : i32 to vector<32x128xi32>
    %85 = arith.cmpi slt, %81, %84 : vector<32x128xi32>
    %c0_i32_43 = arith.constant 0 : i32
    %86 = arith.cmpi slt, %79, %c0_i32_43 : i32
    %87 = vector.broadcast %86 : i1 to vector<32x128xi1>
    %88 = vector.broadcast %87 : vector<32x128xi1> to vector<32x128xi1>
    %89 = arith.xori %85, %88 : vector<32x128xi1>
    %90 = arith.andi %89, %83 : vector<32x128xi1>
    %91 = vector.broadcast %79 : i32 to vector<32x128xi32>
    %92 = arith.addi %81, %91 : vector<32x128xi32>
    %93 = arith.select %90, %92, %81 : vector<32x128xi1>, vector<32x128xi32>
    %c1_i32_44 = arith.constant 1 : i32
    %94 = tpu.dynamic_rotate %75 by %c1_i32_44 dim 0 : vector<32x128xf32>, i32 -> vector<32x128xf32>
    %c1_i32_45 = arith.constant 1 : i32
    %95 = vector.broadcast %c1_i32_45 : i32 to vector<32x128xi32>
    %96 = arith.cmpi slt, %93, %95 : vector<32x128xi32>
    %cst_46 = arith.constant 0.000000e+00 : f32
    %97 = vector.broadcast %cst_46 : f32 to vector<32x128xf32>
    %98 = arith.select %96, %97, %94 : vector<32x128xi1>, vector<32x128xf32>
    %99 = arith.truncf %98 : vector<32x128xf32> to vector<32x128xbf16>
    %c0_47 = arith.constant 0 : index
    %c0_48 = arith.constant 0 : index
    %c0_49 = arith.constant 0 : index
    %100 = vector.load %arg5[%c0_47, %c0_48, %c0_49] : memref<3x128x32xbf16, #tpu.memory_space<vmem>>, vector<1x128x32xbf16>
    %101 = vector.shape_cast %100 : vector<1x128x32xbf16> to vector<128x32xbf16>
    %cst_50 = arith.constant dense<0.000000e+00> : vector<32x32xf32>
    %102 = tpu.matmul %99, %101, %cst_50 {dimension_numbers = #tpu.dot_dimension_numbers<[1], [0], [0], [1], [0, 0, 1, 1], [], []>} : vector<32x128xbf16>, vector<128x32xbf16>, vector<32x32xf32> -> vector<32x32xf32>
    %103 = arith.truncf %75 : vector<32x128xf32> to vector<32x128xbf16>
    %c1_51 = arith.constant 1 : index
    %c0_52 = arith.constant 0 : index
    %c0_53 = arith.constant 0 : index
    %104 = vector.load %arg5[%c1_51, %c0_52, %c0_53] : memref<3x128x32xbf16, #tpu.memory_space<vmem>>, vector<1x128x32xbf16>
    %105 = vector.shape_cast %104 : vector<1x128x32xbf16> to vector<128x32xbf16>
    %cst_54 = arith.constant dense<0.000000e+00> : vector<32x32xf32>
    %106 = tpu.matmul %103, %105, %cst_54 {dimension_numbers = #tpu.dot_dimension_numbers<[1], [0], [0], [1], [0, 0, 1, 1], [], []>} : vector<32x128xbf16>, vector<128x32xbf16>, vector<32x32xf32> -> vector<32x32xf32>
    %107 = arith.addf %102, %106 : vector<32x32xf32>
    %c31_i32_55 = arith.constant 31 : i32
    %108 = tpu.dynamic_rotate %75 by %c31_i32_55 dim 0 : vector<32x128xf32>, i32 -> vector<32x128xf32>
    %c15_i32_56 = arith.constant 15 : i32
    %109 = vector.broadcast %c15_i32_56 : i32 to vector<32x128xi32>
    %110 = arith.cmpi sge, %93, %109 : vector<32x128xi32>
    %cst_57 = arith.constant 0.000000e+00 : f32
    %111 = vector.broadcast %cst_57 : f32 to vector<32x128xf32>
    %112 = arith.select %110, %111, %108 : vector<32x128xi1>, vector<32x128xf32>
    %113 = arith.truncf %112 : vector<32x128xf32> to vector<32x128xbf16>
    %c2_58 = arith.constant 2 : index
    %c0_59 = arith.constant 0 : index
    %c0_60 = arith.constant 0 : index
    %114 = vector.load %arg5[%c2_58, %c0_59, %c0_60] : memref<3x128x32xbf16, #tpu.memory_space<vmem>>, vector<1x128x32xbf16>
    %115 = vector.shape_cast %114 : vector<1x128x32xbf16> to vector<128x32xbf16>
    %cst_61 = arith.constant dense<0.000000e+00> : vector<32x32xf32>
    %116 = tpu.matmul %113, %115, %cst_61 {dimension_numbers = #tpu.dot_dimension_numbers<[1], [0], [0], [1], [0, 0, 1, 1], [], []>} : vector<32x128xbf16>, vector<128x32xbf16>, vector<32x32xf32> -> vector<32x32xf32>
    %117 = arith.addf %107, %116 : vector<32x32xf32>
    %118 = vector.broadcast %76 : vector<1x32xf32> to vector<32x32xf32>
    %119 = arith.addf %117, %118 : vector<32x32xf32>
    %120 = vector.extract_strided_slice %119 {offsets = [0, 0], sizes = [16, 32], strides = [1, 1]} : vector<32x32xf32> to vector<16x32xf32>
    %121 = tpu.transpose %120, [1, 0] : vector<16x32xf32> -> vector<32x16xf32>
    %c0_62 = arith.constant 0 : index
    %c0_63 = arith.constant 0 : index
    %c0_64 = arith.constant 0 : index
    %122 = vector.load %arg2[%c0_62, %c0_63, %c0_64] : memref<2x1x16xf32, #tpu.memory_space<vmem>>, vector<1x1x16xf32>
    %123 = vector.shape_cast %122 : vector<1x1x16xf32> to vector<1x16xf32>
    %124 = vector.broadcast %123 : vector<1x16xf32> to vector<32x16xf32>
    %125 = arith.mulf %121, %124 : vector<32x16xf32>
    %c0_65 = arith.constant 0 : index
    %c0_66 = arith.constant 0 : index
    %c0_67 = arith.constant 0 : index
    %126 = vector.load %arg7[%c0_65, %c0_66, %c0_67] : memref<2x32x16xf32, #tpu.memory_space<vmem>>, vector<1x32x16xf32>
    %127 = vector.shape_cast %126 : vector<1x32x16xf32> to vector<32x16xf32>
    %128 = vector.shape_cast %125 : vector<32x16xf32> to vector<1x32x16xf32>
    tpu.vector_store %arg7[%c0_65, %c0_66, %c0_67], %128 {strides = array<i32>} : memref<2x32x16xf32, #tpu.memory_space<vmem>>, vector<1x32x16xf32>,
    %129 = vector.extract_strided_slice %119 {offsets = [16, 0], sizes = [16, 32], strides = [1, 1]} : vector<32x32xf32> to vector<16x32xf32>
    %130 = tpu.transpose %129, [1, 0] : vector<16x32xf32> -> vector<32x16xf32>
    %c1_68 = arith.constant 1 : index
    %c0_69 = arith.constant 0 : index
    %c0_70 = arith.constant 0 : index
    %131 = vector.load %arg2[%c1_68, %c0_69, %c0_70] : memref<2x1x16xf32, #tpu.memory_space<vmem>>, vector<1x1x16xf32>
    %132 = vector.shape_cast %131 : vector<1x1x16xf32> to vector<1x16xf32>
    %133 = vector.broadcast %132 : vector<1x16xf32> to vector<32x16xf32>
    %134 = arith.mulf %130, %133 : vector<32x16xf32>
    %c1_71 = arith.constant 1 : index
    %c0_72 = arith.constant 0 : index
    %c0_73 = arith.constant 0 : index
    %135 = vector.load %arg7[%c1_71, %c0_72, %c0_73] : memref<2x32x16xf32, #tpu.memory_space<vmem>>, vector<1x32x16xf32>
    %136 = vector.shape_cast %135 : vector<1x32x16xf32> to vector<32x16xf32>
    %137 = vector.shape_cast %134 : vector<32x16xf32> to vector<1x32x16xf32>
    tpu.vector_store %arg7[%c1_71, %c0_72, %c0_73], %137 {strides = array<i32>} : memref<2x32x16xf32, #tpu.memory_space<vmem>>, vector<1x32x16xf32>,
    return
  }
  func.func @transform_0(%arg0: i32) -> (i32, i32, i32) {
    %c0_i32 = arith.constant 0 : i32
    %c0_i32_0 = arith.constant 0 : i32
    %c0_i32_1 = arith.constant 0 : i32
    %c0_i32_2 = arith.constant 0 : i32
    return %c0_i32, %c0_i32_0, %c0_i32_1 : i32, i32, i32
  }
  func.func @transform_1(%arg0: i32) -> (i32, i32, i32) {
    %c0_i32 = arith.constant 0 : i32
    %c0_i32_0 = arith.constant 0 : i32
    %c0_i32_1 = arith.constant 0 : i32
    %c0_i32_2 = arith.constant 0 : i32
    return %c0_i32, %c0_i32_0, %c0_i32_1 : i32, i32, i32
  }
  func.func @transform_2(%arg0: i32) -> (i32, i32, i32) {
    %c0_i32 = arith.constant 0 : i32
    %c0_i32_0 = arith.constant 0 : i32
    %c0_i32_1 = arith.constant 0 : i32
    %c0_i32_2 = arith.constant 0 : i32
    return %c0_i32, %c0_i32_0, %c0_i32_1 : i32, i32, i32
  }
  func.func @transform_3(%arg0: i32) -> (i32, i32) {
    %c0_i32 = arith.constant 0 : i32
    %c0_i32_0 = arith.constant 0 : i32
    %c0_i32_1 = arith.constant 0 : i32
    return %c0_i32, %c0_i32_0 : i32, i32
  }
  func.func @transform_4(%arg0: i32) -> (i32, i32, i32) {
    %c0_i32 = arith.constant 0 : i32
    %c0_i32_0 = arith.constant 0 : i32
    %c0_i32_1 = arith.constant 0 : i32
    %c0_i32_2 = arith.constant 0 : i32
    return %c0_i32, %c0_i32_0, %c0_i32_1 : i32, i32, i32
  }
  func.func @transform_5(%arg0: i32) -> (i32, i32) {
    %c0_i32 = arith.constant 0 : i32
    %c0_i32_0 = arith.constant 0 : i32
    %c0_i32_1 = arith.constant 0 : i32
    return %c0_i32, %c0_i32_0 : i32, i32
  }
  func.func @transform_6(%arg0: i32) -> (i32, i32, i32) {
    %c0_i32 = arith.constant 0 : i32
    %c0_i32_0 = arith.constant 0 : i32
    %c0_i32_1 = arith.constant 0 : i32
    %c0_i32_2 = arith.constant 0 : i32
    return %c0_i32, %c0_i32_0, %c0_i32_1 : i32, i32, i32
  }
}

</mosaic_0001>

<bundles_post_ra>
// kernel: tpu_custom_call.1
= control target key start
LH: loop header
LB: loop body
LE: loop exit
PB: predicated region body
PF: predicated region fallthrough
CT: control target
= control target key end

     0   :  { %v1317_v25 = vmov 0   ;;  %v185_v31 = vlaneseq  ;;  %vm280_vm0 = vcmask 261120   ;;  %vm1318_vm10 = vmmov 1   ;;  %s1629_s0 = inlined_call_operand.vmem [shape: f32[2,32,16], index: 0, kind: input, shape index: {}]   ;;  %s1630_s1 = inlined_call_operand.vmem [shape: f32[2,1,16], index: 1, kind: input, shape index: {}]   ;;  %s1631_s2 = inlined_call_operand.vmem [shape: bf16[3,32,128], index: 2, kind: input, shape index: {}]   ;;  %s1632_s4 = inlined_call_operand.vmem [shape: bf16[3,128,32], index: 4, kind: input, shape index: {}]   ;;  %s1633_s3 = inlined_call_operand.vmem [shape: f32[1,128], index: 3, kind: input, shape index: {}]   ;;  %s1634_s5 = inlined_call_operand.vmem [shape: f32[1,32], index: 5, kind: input, shape index: {}]   ;;  %s1635_s6 = inlined_call_operand.vmem [shape: f32[2,32,16], index: 6, kind: output, shape index: {}]  }
   0x1   :  { %v24_v0 = vld [vmem:[%s1629_s0] sm:$0xff]  ;;  %v25_v5 = vld [vmem:[%s1629_s0 + $0x8] sm:$0xff]  ;;  %v26_v10 = vld [vmem:[%s1629_s0 + $0x10] sm:$0xff] }
   0x2   :  { %v1360_v1 = vld [vmem:[%s1630_s1] ss:$0 sm:$0xff]  ;;  %v1369_v4 = vld [vmem:[%s1630_s1 + $0x1] ss:$0 sm:$0xff]  ;;  %v1017_v6 = vld [vmem:[%s1629_s0 + $0x28] sm:$0xff]  ;;  %v1419_v34 = vshrl.u32 %v185_v31, 7 }
   0x3   :  { %v1016_v2 = vld [vmem:[%s1629_s0 + $0x20] sm:$0xff]  ;;  %v35_v3 = vmul.f32 %v1360_v1, %v24_v0  ;;  %71 = vxpose.xlu1.b32.start.end [1/1] (short) (narrow) %v1360_v1, 16  ;;  %v36_v8 = vmul.f32 %v1360_v1, %v25_v5  ;;  %v117_v9 = vmul.f32 %v1369_v4, %v1017_v6  ;;  %v1018_v11 = vld [vmem:[%s1629_s0 + $0x30] sm:$0xff]  ;;  %v27_v13 = vld [vmem:[%s1629_s0 + $0x18] sm:$0xff]  ;;  %v37_v16 = vmul.f32 %v1360_v1, %v26_v10 }
   0x4   :  { %v116_v7 = vmul.f32 %v1369_v4, %v1016_v2  ;;  %v1019_v14 = vld [vmem:[%s1629_s0 + $0x38] sm:$0xff]  ;;  %v118_v17 = vmul.f32 %v1369_v4, %v1018_v11  ;;  %v1287_v18 = vld [vmem:[%s1631_s2 + $0x10] sm:$0xff]   ;;  %v38_v20 = vmul.f32 %v1360_v1, %v27_v13  ;;  %v1289_v24 = vld [vmem:[%s1631_s2] sm:$0xff]   ;;  %v194_v36 = vand.u32 15, %v1419_v34 }
   0x5   :  { %v1269_v15 = vpack.i.bf16 %v117_v9, %v36_v8  ;;  %1164 = vmatprep.subr.bf16.mxu0 %v1287_v18  ;;  %v119_v21 = vmul.f32 %v1369_v4, %v1019_v14  ;;  %v1288_v22 = vld [vmem:[%s1631_s2 + $0x18] sm:$0xff]   ;;  %v1294_v26 = vld [vmem:[%s1632_s4] sm:$0xff]   ;;  %v1296_v27 = vld [vmem:[%s1632_s4 + $0x8] sm:$0xff]   ;;  %vm242_vm1 = vcmp.lt.s32.totalorder %v1419_v34, 1  ;;  %v188_v42 = vadd.s32 16, %v1419_v34 }
   0x6   :  { %v1267_v12 = vpack.i.bf16 %v116_v7, %v35_v3  ;;  %v1271_v19 = vpack.i.bf16 %v118_v17, %v37_v16  ;;  %1165 = vmatpush3.bf16.msra.mxu0 %v1287_v18  ;;  %1208 = vmatprep.subr.bf16.mxu1 %v1294_v26  ;;  %v1298_v28 = vld [vmem:[%s1632_s4 + $0x10] sm:$0xff]   ;;  %v1300_v30 = vld [vmem:[%s1632_s4 + $0x18] sm:$0xff]   ;;  %vm1430_vm2 = vcmp.lt.s32.totalorder %v194_v36, 1  ;;  %v1302_v48 = vld [vmem:[%s1632_s4 + $0x20] sm:$0xff]   ;;  %v187_v51 = vadd.s32 8, %v1419_v34 }
   0x7   :  { %1166 = vmatprep.subr.bf16.mxu0 %v1288_v22  ;;  %v1273_v23 = vpack.i.bf16 %v119_v21, %v38_v20  ;;  %1209 = vmatpush3.bf16.msra.mxu1 %v1294_v26  ;;  %v1290_v54 = vld [vmem:[%s1631_s2 + $0x8] sm:$0xff]   ;;  %v208_v57 = vand.u32 15, %v188_v42  ;;  %v1291_v61 = vld [vmem:[%s1631_s2 + $0x20] sm:$0xff]   ;;  %vm407_vm3 = vcmp.lt.s32.totalorder %v1419_v34, 7  ;;  %v189_v10 = vadd.s32 24, %v1419_v34  ;;  %v1308_v31 = vld [vmem:[%s1632_s4 + $0x38] sm:$0xff]  }
   0x8   :  { %1268 = vxpose.xlu0.b32.start [1/4] (short) (narrow) %v1267_v12, 16  ;;  %152 = vxpose.xlu1.b32.start.end [1/1] (short) (narrow) %v1369_v4, 16  ;;  %v201_v59 = vand.u32 15, %v187_v51  ;;  %v1292_v12 = vld [vmem:[%s1631_s2 + $0x28] sm:$0xff]   ;;  %v1293_v16 = vld [vmem:[%s1632_s4 + $0x40] sm:$0xff]   ;;  %vm1075_vm7 = vmneg %vm1430_vm2 }
   0x9   :  { %1210 = vmatprep.subr.bf16.mxu1 %v1296_v27  ;;  %vm1458_vm4 = vcmp.lt.s32.totalorder %v208_v57, 1  ;;  %v1303_v26 = vld [vmem:[%s1632_s4 + $0x68] sm:$0xff]   ;;  %v1042_v36 = vld [vmem:[%s1633_s3] ss:$0 sm:$0xff]  ;;  %vm1076_vm11 = vmpackc.low %vm1318_vm10, %vm1075_vm7 }
   0xa   :  { %1167 = vmatpush3.bf16.msra.mxu0 %v1288_v22  ;;  %vm1464_vm5 = vcmp.ge.s32.totalorder %v201_v59, 15  ;;  %v1295_v22 = vld [vmem:[%s1632_s4 + $0x48] sm:$0xff]   ;;  %vm1079_vm8 = vmneg %vm1458_vm4  ;;  %v1311_v34 = vld [vmem:[%s1632_s4 + $0x90] sm:$0xff]  }
   0xb   :  { %1172 = vmatprep.subr.bf16.mxu0 %v1289_v24  ;;  %1211 = vmatpush3.bf16.msra.mxu1 %v1296_v27  ;;  %v1304_v27 = vld [vmem:[%s1632_s4 + $0x28] sm:$0xff]   ;;  %vm1107_vm9 = vmneg %vm1464_vm5  ;;  %v1312_v0 = vld [vmem:[%s1632_s4 + $0x98] sm:$0xff]  }
   0xc   :  { %1270 = vxpose.xlu0.b32.cont [2/4] (short) (narrow) %v1269_v15, 16  ;;  %1212 = vmatprep.subr.bf16.mxu1 %v1298_v28  ;;  %v215_v15 = vand.u32 15, %v189_v10  ;;  %vm1080_vm12 = vmpackc.low %vm1318_vm10, %vm1079_vm8 }
   0xd   :  { %vm1108_vm13 = vmpackc.low %vm1107_vm9, %vm1318_vm10 }
   0xe   :  { %vm1489_vm6 = vcmp.ge.s32.totalorder %v215_v15, 15 }
   0xf   :  { %1213 = vmatpush3.bf16.msra.mxu1 %v1298_v28  ;;  %v1305_v28 = vld [vmem:[%s1632_s4 + $0x70] sm:$0xff]   ;;  %vm1111_vm14 = vmneg %vm1489_vm6 }
  0x10   :  { %1272 = vxpose.xlu0.b32.cont [3/4] (short) (narrow) %v1271_v19, 16  ;;  %1214 = vmatprep.subr.bf16.mxu1 %v1300_v30  ;;  %vm1112_vm15 = vmpackc.low %vm1111_vm14, %vm1318_vm10 }
  0x13   :  { %1215 = vmatpush3.bf16.msra.mxu1 %v1300_v30  ;;  %v1307_v30 = vld [vmem:[%s1632_s4 + $0x78] sm:$0xff]  }
  0x14   :  { %1274 = vxpose.xlu0.b32.end [4/4] (short) (narrow) %v1273_v23, 16  ;;  %1216 = vmatprep.subr.bf16.mxu1 %v1302_v48  ;;  %v1297_v23 = vld [vmem:[%s1632_s4 + $0x50] sm:$0xff]  }
  0x17   :  { %1217 = vmatpush3.bf16.msra.mxu1 %v1302_v48 }
  0x18   :  { %1218 = vmatprep.subr.bf16.mxu1 %v1304_v27 }
  0x1b   :  { %1219 = vmatpush3.bf16.msra.mxu1 %v1304_v27 }
  0x26   :  { %1285 = vset.pattern.permute.xlu1 %v1317_v25 }
  0x3d   :  { %1286 = vset.pattern.permute.xlu0 %v1317_v25  ;;  %v1301_v25 = vld [vmem:[%s1632_s4 + $0x60] sm:$0xff]  }
  0x83   :  { %v87_v29 = vpop.trf.xlu1 }
  0x84   :  { %514 = vperm.xlu1 %1285, %v87_v29   ;;  %v1306_v29 = vld [vmem:[%s1632_s4 + $0x30] sm:$0xff]  }
  0x85   :  { %1220 = vmatprep.subr.bf16.mxu1 %v1306_v29 }
  0x86   :  { %1221 = vmatpush3.bf16.msra.mxu1 %v1306_v29 }
  0x87   :  { %v88_v32 = vpop.trf.xlu1  ;;  %1222 = vmatprep.subr.bf16.mxu1 %v1308_v31 }
  0x88   :  { %v1275_v33 = vpop.trf.xlu0  ;;  %519 = vperm.xlu0 %1286, %v88_v32   ;;  %v1309_v32 = vld [vmem:[%s1632_s4 + $0x80] sm:$0xff]  }
  0x89   :  { %v1421_v35 = vunpack.i.l.bf16 %v1275_v33  ;;  %v1279_v41 = vunpack.i.h.bf16 %v1275_v33 }
  0x8a   :  { %1223 = vmatpush3.bf16.msra.mxu1 %v1308_v31 }
  0x8b   :  { %v168_v37 = vpop.trf.xlu1  ;;  %v238_v43 = vrot.slane %v1421_v35, 7  ;;  %v240_v60 = vrot.slane %v1279_v41, 7  ;;  %v405_v62 = vrot.slane %v1279_v41, 1  ;;  %v403_v5 = vrot.slane %v1421_v35, 1  ;;  %1228 = vmatprep.subr.bf16.mxu1 %v1309_v32 }
  0x8c   :  { %v1280_v38 = vpop.trf.xlu0 }
  0x8d   :  { %v1424_v39 = vunpack.i.h.bf16 %v1280_v38  ;;  %v1281_v40 = vunpack.i.l.bf16 %v1280_v38 }
  0x8f   :  { %v241_v44 = vrot.slane %v1424_v39, 7  ;;  %v239_v45 = vrot.slane %v1281_v40, 7  ;;  %v169_v47 = vpop.trf.xlu1  ;;  %v261_v49 = vpack.c.bf16 %v1281_v40, %v1421_v35  ;;  %v262_v50 = vpack.c.bf16 %v1424_v39, %v1279_v41 }
  0x90   :  { %529 = vperm.xlu1 %1285, %v169_v47   ;;  %v404_v58 = vrot.slane %v1281_v40, 1  ;;  %v406_v14 = vrot.slane %v1424_v39, 1 }
  0x91   :  { %v245_v52 = vsel %vm242_vm1, %v238_v43, %v239_v45  ;;  %v246_v53 = vsel %vm242_vm1, %v241_v44, %v238_v43  ;;  %1168 = vmatprep.mubr.msk.bf16.mxu0 %vm280_vm0, %v261_v49  ;;  %v244_v63 = vsel %vm242_vm1, %v239_v45, %v240_v60  ;;  %v243_v6 = vsel %vm242_vm1, %v240_v60, %v241_v44 }
  0x92   :  { %v251_v55 = vsel %vm1430_vm2, 0.0, %v246_v53  ;;  %1169 = vmatmul.mubr.msk.bf16.vlgmr.msra.gmra.mrb[0].mxu0 %vm280_vm0, %v262_v50  ;;  %v409_v2 = vsel %vm407_vm3, %v404_v58, %v405_v62  ;;  %v253_v7 = vsel %vm1458_vm4, 0.0, %v244_v63  ;;  %v410_v8 = vsel %vm407_vm3, %v403_v5, %v404_v58 }
  0x93   :  { %v255_v56 = vpack.c.bf16 %v245_v52, %v251_v55  ;;  %1173 = vmatpush3.bf16.msra.mxu0 %v1289_v24  ;;  %v417_v9 = vsel %vm1464_vm5, 0.0, %v409_v2  ;;  %v256_v11 = vpack.c.bf16 %v243_v6, %v253_v7  ;;  %v411_v17 = vsel %vm407_vm3, %v406_v14, %v403_v5  ;;  %v1299_v24 = vld [vmem:[%s1632_s4 + $0x58] sm:$0xff]  }
  0x94   :  { %524 = vperm.xlu1 %1285, %v168_v37   ;;  %1174 = vmatprep.subr.bf16.mxu0 %v1290_v54  ;;  %v420_v13 = vpack.c.bf16 %v417_v9, %v410_v8  ;;  %v408_v19 = vsel %vm407_vm3, %v405_v62, %v406_v14  ;;  %v419_v20 = vsel %vm1489_vm6, 0.0, %v411_v17  ;;  %v1313_v17 = vld [vmem:[%s1632_s4 + $0xa0] sm:$0xff]  }
  0x95   :  { %1176 = vmatprep.mubr.msk.bf16.mxu0 %vm280_vm0, %v255_v56  ;;  %v421_v21 = vpack.c.bf16 %v419_v20, %v408_v19  ;;  %v1314_v19 = vld [vmem:[%s1632_s4 + $0xa8] sm:$0xff]   ;;  %v1315_v20 = vld [vmem:[%s1632_s4 + $0xb0] sm:$0xff]  }
  0x97   :  { %1175 = vmatpush3.bf16.msra.mxu0 %v1290_v54 }
  0x98   :  { %1180 = vmatprep.subr.bf16.mxu0 %v1291_v61 }
  0x9e   :  { %1177 = vmatmul.mubr.msk.bf16.vlgmr.msra.gmra.mrb[0].mxu0 %vm280_vm0, %v256_v11 }
  0x9f   :  { %1181 = vmatpush3.bf16.msra.mxu0 %v1291_v61  ;;  %1184 = vmatprep.mubr.msk.bf16.mxu0 %vm280_vm0, %v420_v13 }
  0xa0   :  { %1182 = vmatprep.subr.bf16.mxu0 %v1292_v12 }
  0xa3   :  { %1183 = vmatpush3.bf16.msra.mxu0 %v1292_v12 }
  0xa4   :  { %1188 = vmatprep.subr.bf16.mxu0 %v1293_v16 }
  0xaa   :  { %1185 = vmatmul.mubr.msk.bf16.vlgmr.msra.gmra.mrb[0].mxu0 %vm280_vm0, %v421_v21  ;;  %v1316_v21 = vld [vmem:[%s1632_s4 + $0xb8] sm:$0xff]   ;;  %vm958_vm0 = vcmask 130048  }
  0xab   :  { %1189 = vmatpush3.bf16.msra.mxu0 %v1293_v16  ;;  %v1310_v16 = vld [vmem:[%s1632_s4 + $0x88] sm:$0xff]  }
  0xac   :  { %1190 = vmatprep.subr.bf16.mxu0 %v1295_v22 }
  0xaf   :  { %1191 = vmatpush3.bf16.msra.mxu0 %v1295_v22 }
  0xb0   :  { %1192 = vmatprep.subr.bf16.mxu0 %v1297_v23 }
  0xb3   :  { %1193 = vmatpush3.bf16.msra.mxu0 %v1297_v23 }
  0xb4   :  { %1194 = vmatprep.subr.bf16.mxu0 %v1299_v24 }
  0xb7   :  { %1195 = vmatpush3.bf16.msra.mxu0 %v1299_v24 }
  0xb8   :  { %1196 = vmatprep.subr.bf16.mxu0 %v1301_v25 }
  0xbb   :  { %1197 = vmatpush3.bf16.msra.mxu0 %v1301_v25 }
  0xbc   :  { %1198 = vmatprep.subr.bf16.mxu0 %v1303_v26 }
  0xbf   :  { %1199 = vmatpush3.bf16.msra.mxu0 %v1303_v26  ;;  %v1115_v26 = vld [vmem:[%s1634_s5] ss:$0 sm:$0xff] }
  0xc0   :  { %1200 = vmatprep.subr.bf16.mxu0 %v1305_v28 }
  0xc3   :  { %1201 = vmatpush3.bf16.msra.mxu0 %v1305_v28 }
  0xc4   :  { %1202 = vmatprep.subr.bf16.mxu0 %v1307_v30 }
  0xc7   :  { %1203 = vmatpush3.bf16.msra.mxu0 %v1307_v30 }
 0x103   :  { %v515_v33 = vpop.permute.xlu1 %514 }
 0x107   :  { %v520_v53 = vpop.permute.xlu0 %519 }
 0x10f   :  { %v530_v35 = vpop.permute.xlu1 %529 }
 0x113   :  { %v525_v45 = vpop.permute.xlu1 %524 }
 0x17d   :  { %v1186_v37 = vpop.f32.mrb[0].mxu0 }
 0x17e   :  { %v506_v38 = vadd.f32 %v1186_v37, %v1042_v36  ;;  %v479_v39 = vpop.f32.mrb[1].mxu0 }
 0x17f   :  { %v504_v40 = vadd.f32 %v1042_v36, %v479_v39  ;;  %v1187_v41 = vpop.f32.mrb[2].mxu0 }
 0x180   :  { %v510_v42 = vmax.f32 %v506_v38, 0.0  ;;  %v507_v43 = vadd.f32 %v1187_v41, %v1042_v36  ;;  %v482_v44 = vpop.f32.mrb[3].mxu0 }
 0x181   :  { %v508_v47 = vmax.f32 %v504_v40, 0.0  ;;  %v505_v48 = vadd.f32 %v1042_v36, %v482_v44 }
 0x182   :  { %v534_v49 = vmul.f32 %v525_v45, %v510_v42  ;;  %v511_v50 = vmax.f32 %v507_v43, 0.0 }
 0x183   :  { %v532_v51 = vmul.f32 %v515_v33, %v508_v47  ;;  %v509_v52 = vmax.f32 %v505_v48, 0.0 }
 0x184   :  { %v535_v54 = vmul.f32 %v530_v35, %v511_v50  ;;  %v539_v55 = vrot.slane %v534_v49, 7  ;;  %v782_v59 = vrot.slane %v534_v49, 1 }
 0x185   :  { %v780_v56 = vrot.slane %v532_v51, 1  ;;  %v533_v57 = vmul.f32 %v520_v53, %v509_v52  ;;  %v537_v58 = vrot.slane %v532_v51, 7 }
 0x186   :  { %v783_v60 = vrot.slane %v535_v54, 1  ;;  %v568_v61 = vpack.c.bf16 %v535_v54, %v534_v49  ;;  %v540_v62 = vrot.slane %v535_v54, 7 }
 0x187   :  { %v781_v63 = vrot.slane %v533_v57, 1  ;;  %v567_v2 = vpack.c.bf16 %v533_v57, %v532_v51  ;;  %v538_v5 = vrot.slane %v533_v57, 7 }
 0x188   :  { %v784_v6 = vsel %vm407_vm3, %v782_v59, %v783_v60  ;;  %v787_v7 = vsel %vm407_vm3, %v783_v60, %v780_v56  ;;  %v544_v8 = vsel %vm242_vm1, %v540_v62, %v537_v58  ;;  %v541_v9 = vsel %vm242_vm1, %v539_v55, %v540_v62 }
 0x189   :  { %1204 = vmatprep.mubr.bf16.mxu0 %v567_v2  ;;  %v543_v46 = vsel %vm242_vm1, %v537_v58, %v538_v5  ;;  %v542_v10 = vsel %vm242_vm1, %v538_v5, %v539_v55  ;;  %v785_v11 = vsel %vm407_vm3, %v781_v63, %v782_v59  ;;  %v786_v12 = vsel %vm407_vm3, %v780_v56, %v781_v63 }
 0x18a   :  { %1205 = vmatmul.mubr.bf16.vlgmr.msra.gmra.mrb[4].mxu0 %v568_v61  ;;  %v1077_v13 = vpack.c.bf16 %v543_v46, %v544_v8  ;;  %v1081_v3 = vpack.c.bf16 %v541_v9, %v542_v10  ;;  %v1109_v14 = vpack.c.bf16 %v785_v11, %v786_v12  ;;  %v1113_v15 = vpack.c.bf16 %v787_v7, %v784_v6 }
 0x18c   :  { %1224 = vmatprep.mubr.msk.bf16.mxu1 %vm1076_vm11, %v1077_v13 }
 0x18d   :  { %1225 = vmatmul.mubr.msk.bf16.vlgmr.msra.gmra.mrb[0].mxu1 %vm1080_vm12, %v1081_v3 }
 0x18e   :  { %1229 = vmatpush3.bf16.msra.mxu1 %v1309_v32  ;;  %1244 = vmatprep.mubr.msk.bf16.mxu1 %vm1108_vm13, %v1109_v14 }
 0x18f   :  { %1230 = vmatprep.subr.bf16.mxu1 %v1310_v16 }
 0x192   :  { %1231 = vmatpush3.bf16.msra.mxu1 %v1310_v16 }
 0x193   :  { %1232 = vmatprep.subr.bf16.mxu1 %v1311_v34 }
 0x196   :  { %1233 = vmatpush3.bf16.msra.mxu1 %v1311_v34 }
 0x197   :  { %1234 = vmatprep.subr.bf16.mxu1 %v1312_v0 }
 0x19a   :  { %1235 = vmatpush3.bf16.msra.mxu1 %v1312_v0 }
 0x19b   :  { %1236 = vmatprep.subr.bf16.mxu1 %v1313_v17 }
 0x19e   :  { %1237 = vmatpush3.bf16.msra.mxu1 %v1313_v17 }
 0x19f   :  { %1238 = vmatprep.subr.bf16.mxu1 %v1314_v19 }
 0x1a2   :  { %1239 = vmatpush3.bf16.msra.mxu1 %v1314_v19 }
 0x1a3   :  { %1240 = vmatprep.subr.bf16.mxu1 %v1315_v20 }
 0x1a6   :  { %1241 = vmatpush3.bf16.msra.mxu1 %v1315_v20 }
 0x1a7   :  { %1242 = vmatprep.subr.bf16.mxu1 %v1316_v21 }
 0x1aa   :  { %1243 = vmatpush3.bf16.msra.mxu1 %v1316_v21 }
 0x1ad   :  { %1245 = vmatmul.mubr.msk.bf16.vlgmr.msra.gmra.mrb[0].mxu1 %vm1112_vm15, %v1113_v15 }
 0x25d   :  { %v1206_v22 = vpop.f32.mrb[4].mxu0 }
 0x25e   :  { %v668_v23 = vpop.f32.mrb[5].mxu0 }
 0x25f   :  { %v1207_v24 = vpop.f32.mrb[6].mxu0 }
 0x260   :  { %v671_v25 = vpop.f32.mrb[7].mxu0 }
 0x280   :  { %v1246_v27 = vpop.f32.mrb[0].mxu1 }
 0x281   :  { %v1248_v28 = vadd.f32 %v1246_v27, %v1206_v22  ;;  %v893_v29 = vpop.f32.mrb[1].mxu1 }
 0x282   :  { %v1249_v30 = vadd.f32 %v893_v29, %v668_v23  ;;  %v1247_v31 = vpop.f32.mrb[2].mxu1 }
 0x283   :  { %v920_v32 = vadd.f32 %v1248_v28, %v1115_v26  ;;  %v1250_v18 = vadd.f32 %v1247_v31, %v1207_v24  ;;  %v896_v33 = vpop.f32.mrb[3].mxu1 }
 0x284   :  { %v918_v35 = vadd.f32 %v1249_v30, %v1115_v26  ;;  %v1251_v36 = vadd.f32 %v896_v33, %v671_v25 }
 0x285   :  { %963 = vxpose.xlu0.b32.start [1/2] (short) (narrow) %v920_v32, 32  ;;  %v921_v37 = vadd.f32 %v1250_v18, %v1115_v26 }
 0x286   :  { %922 = vxpose.xlu1.b32.start [1/2] (short) (narrow) %v918_v35, 32  ;;  %v919_v38 = vadd.f32 %v1251_v36, %v1115_v26 }
 0x289   :  { %964 = vxpose.xlu0.b32.end [2/2] (short) (narrow) %v921_v37, 32 }
 0x28a   :  { %923 = vxpose.xlu1.b32.end [2/2] (short) (narrow) %v919_v38, 32 }
 0x305   :  { %v979_v39 = vpop.trf.xlu0 }
 0x306   :  { %v1002_v40 = vmul.f32 %v1369_v4, %v979_v39  ;;  %v938_v41 = vpop.trf.xlu1 }
 0x307   :  { %v954_v42 = vmul.f32 %v1360_v1, %v938_v41 }
 0x308   :  { %1118 = vst.msk [vmem:[%s1635_s6 + $0x20] sm:$0xff] %vm958_vm0, %v1002_v40 }
 0x309   :  { %959 = vst.msk [vmem:[%s1635_s6] sm:$0xff] %vm958_vm0, %v954_v42  ;;  %v980_v43 = vpop.trf.xlu0 }
 0x30a   :  { %v1003_v44 = vmul.f32 %v1369_v4, %v980_v43  ;;  %v939_v45 = vpop.trf.xlu1 }
 0x30b   :  { %v955_v47 = vmul.f32 %v1360_v1, %v939_v45 }
 0x30c   :  { %1119 = vst.msk [vmem:[%s1635_s6 + $0x28] sm:$0xff] %vm958_vm0, %v1003_v44 }
 0x30d   :  { %960 = vst.msk [vmem:[%s1635_s6 + $0x8] sm:$0xff] %vm958_vm0, %v955_v47  ;;  %v981_v48 = vpop.trf.xlu0 }
 0x30e   :  { %v1004_v49 = vmul.f32 %v1369_v4, %v981_v48  ;;  %v940_v50 = vpop.trf.xlu1 }
 0x30f   :  { %v956_v51 = vmul.f32 %v1360_v1, %v940_v50 }
 0x310   :  { %1120 = vst.msk [vmem:[%s1635_s6 + $0x30] sm:$0xff] %vm958_vm0, %v1004_v49 }
 0x311   :  { %961 = vst.msk [vmem:[%s1635_s6 + $0x10] sm:$0xff] %vm958_vm0, %v956_v51  ;;  %v982_v52 = vpop.trf.xlu0 }
 0x312   :  { %v1005_v53 = vmul.f32 %v1369_v4, %v982_v52  ;;  %v941_v54 = vpop.trf.xlu1 }
 0x313   :  { %v957_v55 = vmul.f32 %v1360_v1, %v941_v54 }
 0x314   :  { %1121 = vst.msk [vmem:[%s1635_s6 + $0x38] sm:$0xff] %vm958_vm0, %v1005_v53 }
 0x315   :  { %962 = vst.msk [vmem:[%s1635_s6 + $0x18] sm:$0xff] %vm958_vm0, %v957_v55 }

</bundles_post_ra>
